<compile_context>
chip_gen: v5e
topology: v5e:2x2
jax: 0.10.0
libtpu: 0.0.40
codegen_flags: <defaults>
</compile_context>

<pallas_src>
import jax
import jax.numpy as jnp
import numpy as np
from jax.experimental import pallas as pl
from jax.experimental.pallas import tpu as pltpu

MAX_S = 128     # per-ray sample window (sublane axis); must be a multiple of 8
RAY_TILE = 256  # rays per grid step (lane axis); multiple of 128
LANE = 128


# ----------------------------------------------------------------------------
# Ray kernel: per-ray depth loss + distortion loss, RAY_TILE rays per step
# ----------------------------------------------------------------------------
def _ray_losses_kernel(tri_ref, ws_ref, deltas_ref, ts_ref, td_ref,
                       depth_out_ref, dist_out_ref):
    ws = ws_ref[...]          # (MAX_S, R), invalid samples already zeroed
    ts = ts_ref[...]          # (MAX_S, R)
    deltas = deltas_ref[...]  # (MAX_S, R)
    tri = tri_ref[...]        # (MAX_S, MAX_S) lower-triangular ones

    # Inclusive prefix sums along the sample (sublane) axis via MXU matmuls.
    w_cum = jnp.dot(tri, ws, preferred_element_type=jnp.float32)
    wt_cum = jnp.dot(tri, ws * ts, preferred_element_type=jnp.float32)

    # Distortion loss (Mip-NeRF 360 / DVGO-v2 inclusive-scan form, as in vren):
    #   L_r = sum_s 2*w_s*(t_s*W_s - WT_s) + (1/3)*w_s^2*delta_s
    loss_bi = 2.0 * ws * (ts * w_cum - wt_cum)
    loss_uni = ws * ws * deltas * (1.0 / 3.0)
    dist_out_ref[...] = jnp.sum(loss_bi + loss_uni, axis=0, keepdims=True)

    # Depth loss: render-weighted squared distance of sample midpoints to the
    # per-ray target depth.
    # TODO(synk): exact vren.depth_loss_fw CUDA semantics are unavailable;
    # this implements sum_s w_s*(t_s - target_depth[ray])^2; the predicted
    # per-ray depth argument is only saved for backward in the torch op.
    d = ts - td_ref[...]      # (MAX_S, R) - (1, R)
    depth_out_ref[...] = jnp.sum(ws * d * d, axis=0, keepdims=True)


def ray_losses(ws, deltas, ts, rays_a, target_depth):
    """Returns (depth_loss, distortion_loss), each shape (N_rays,) float32."""
    n_rays = rays_a.shape[0]
    nr_pad = ((n_rays + RAY_TILE - 1) // RAY_TILE) * RAY_TILE
    rays_pad = jnp.pad(rays_a.astype(jnp.int32),
                       ((0, nr_pad - n_rays), (0, 0)))

    ws32 = ws.astype(jnp.float32)
    ts32 = ts.astype(jnp.float32)
    de32 = deltas.astype(jnp.float32)
    td32 = target_depth.astype(jnp.float32)

    # Lane-major per-ray windows: (MAX_S, nr_pad), samples on sublanes.
    soff = jnp.arange(MAX_S, dtype=jnp.int32)[:, None]       # (MAX_S, 1)
    start = rays_pad[:, 1][None, :]                          # (1, nr_pad)
    nsamp = rays_pad[:, 2][None, :]                          # (1, nr_pad)
    # TODO(synk): rays with more than MAX_S samples are truncated to MAX_S.
    valid = soff < nsamp
    idx = jnp.where(valid, start + soff, 0)
    ws_win = jnp.where(valid, ws32[idx], 0.0)
    ts_win = jnp.where(valid, ts32[idx], 0.0)
    de_win = jnp.where(valid, de32[idx], 0.0)
    td_row = td32[rays_pad[:, 0]][None, :]                   # (1, nr_pad)

    tri = jnp.tril(jnp.ones((MAX_S, MAX_S), jnp.float32))    # hoisted constant

    n_blk = nr_pad // RAY_TILE
    depth_row, dist_row = pl.pallas_call(
        _ray_losses_kernel,
        grid=(n_blk,),
        in_specs=[
            pl.BlockSpec((MAX_S, MAX_S), lambda i: (0, 0)),        # tri
            pl.BlockSpec((MAX_S, RAY_TILE), lambda i: (0, i)),     # ws
            pl.BlockSpec((MAX_S, RAY_TILE), lambda i: (0, i)),     # deltas
            pl.BlockSpec((MAX_S, RAY_TILE), lambda i: (0, i)),     # ts
            pl.BlockSpec((1, RAY_TILE), lambda i: (0, i)),         # target d
        ],
        out_specs=[pl.BlockSpec((1, RAY_TILE), lambda i: (0, i))] * 2,
        out_shape=(jax.ShapeDtypeStruct((1, nr_pad), jnp.float32),
                   jax.ShapeDtypeStruct((1, nr_pad), jnp.float32)),
        compiler_params=pltpu.CompilerParams(
            dimension_semantics=("parallel",)),
    )(tri, ws_win, de_win, ts_win, td_row)

    # Scatter per-entry losses to their ray indices (matches torch semantics
    # where the output is indexed by rays_a[:, 0]).
    ray_idx = rays_a[:, 0].astype(jnp.int32)
    depth_l = jnp.zeros((n_rays,), jnp.float32).at[ray_idx].set(
        depth_row[0, :n_rays])
    dist_l = jnp.zeros((n_rays,), jnp.float32).at[ray_idx].set(
        dist_row[0, :n_rays])
    return depth_l, dist_l


# ----------------------------------------------------------------------------
# Fused elementwise terms: rgb L2, opacity entropy, masked ws^2 regularization
# ----------------------------------------------------------------------------
def _elementwise_kernel(rgb_ref, rgb_tgt_ref, op_ref, ws_ref, mask_ref,
                        rgb_out_ref, op_out_ref, wsreg_out_ref):
    diff = rgb_ref[...] - rgb_tgt_ref[...]
    rgb_out_ref[...] = diff * diff
    o = op_ref[...] + 1e-10
    op_out_ref[...] = -o * jnp.log(o)
    w = ws_ref[...]
    wsreg_out_ref[...] = jnp.where(mask_ref[...] > 0, w * w, 0.0)


def elementwise_terms(rgb_pred, rgb_target, opacity, ws, mask):
    b, c = rgb_target.shape
    n = ws.shape[0]
    # Pad the per-sample arrays to a multiple of 8*128 and view them as a
    # sublane+lane dense (rows, 128) slab (unmasked loads/stores, full vregs).
    chunk = 8 * LANE
    n_pad = ((n + chunk - 1) // chunk) * chunk
    rows = n_pad // LANE
    ws_2d = jnp.pad(ws.astype(jnp.float32), (0, n_pad - n)).reshape(rows, LANE)
    mask_2d = jnp.pad(mask.astype(jnp.int32), (0, n_pad - n)).reshape(rows, LANE)

    rgb_l_t, op_l, ws_reg2d = pl.pallas_call(
        _elementwise_kernel,
        out_shape=(jax.ShapeDtypeStruct((c, b), jnp.float32),
                   jax.ShapeDtypeStruct((1, b), jnp.float32),
                   jax.ShapeDtypeStruct((rows, LANE), jnp.float32)),
    )(rgb_pred[:b].T.astype(jnp.float32),
      rgb_target.T.astype(jnp.float32),
      opacity[:b].reshape(1, b).astype(jnp.float32),
      ws_2d, mask_2d)
    return rgb_l_t.T, op_l[0], ws_reg2d.reshape(-1)[:n]


# ----------------------------------------------------------------------------
# NeRFLoss (forward only)
# ----------------------------------------------------------------------------
class NeRFLoss:
    def __init__(self, lambda_opacity=0.001, lambda_distortion=0.001):
        self.lambda_opacity = lambda_opacity
        self.lambda_distortion = lambda_distortion

    def __call__(self, results, target):
        d = {}
        rgb_l, op_l, ws_reg = elementwise_terms(
            results['rgb'], target['rgb'], results['opacity'],
            results['ws'], results['mask'])
        d['rgb'] = rgb_l
        d['opacity'] = self.lambda_opacity * op_l
        # NOTE: torch returns ws[mask]**2 (dynamic length); here we return the
        # full-length array with masked-out entries set to 0.
        d['depth_regularization'] = 0.01 * ws_reg
        depth_l, dist_l = ray_losses(results['ws'], results['deltas'],
                                     results['ts'], results['rays_a'],
                                     target['depth_value'])
        d['depth'] = 0.01 * depth_l
        if self.lambda_distortion > 0:
            d['distortion'] = self.lambda_distortion * dist_l
        return d


if __name__ == "__main__":
    key = jax.random.PRNGKey(0)
    n_rays = 8
    b = 4
    n_samples = np.array([32, 24, 32, 16, 32, 8, 32, 32], dtype=np.int32)
    start = np.concatenate([[0], np.cumsum(n_samples)[:-1]]).astype(np.int32)
    n = int(n_samples.sum())
    rays_a = jnp.asarray(np.stack(
        [np.arange(n_rays, dtype=np.int32), start, n_samples], axis=1))

    ks = jax.random.split(key, 8)
    ws = 0.1 * jax.random.uniform(ks[0], (n,), dtype=jnp.float32)
    deltas = 0.01 + 0.05 * jax.random.uniform(ks[1], (n,), dtype=jnp.float32)
    ts = jnp.cumsum(deltas) - 0.5 * deltas
    mask = (jax.random.uniform(ks[2], (n,)) > 0.3).astype(jnp.int32)
    rgb_pred = jax.random.uniform(ks[3], (n_rays, 3), dtype=jnp.float32)
    opacity = jax.random.uniform(ks[4], (n_rays,), dtype=jnp.float32)
    depth = 3.0 * jax.random.uniform(ks[5], (n_rays,), dtype=jnp.float32)
    target_rgb = jax.random.uniform(ks[6], (b, 3), dtype=jnp.float32)
    target_depth = 3.0 * jax.random.uniform(ks[7], (n_rays,), dtype=jnp.float32)

    results = dict(rgb=rgb_pred, opacity=opacity, depth=depth, ws=ws,
                   deltas=deltas, ts=ts, mask=mask, rays_a=rays_a)
    target = dict(rgb=target_rgb, depth_value=target_depth)

    loss_fn = NeRFLoss()
    d = loss_fn(results, target)
    d = jax.block_until_ready(d)

    # ---- pure numpy reference check ----
    ws_n, de_n, ts_n, td_n = map(np.asarray, (ws, deltas, ts, target_depth))
    dist_ref = np.zeros(n_rays, np.float64)
    depth_ref = np.zeros(n_rays, np.float64)
    for r in range(n_rays):
        s0, ns = int(start[r]), int(n_samples[r])
        w, t, de = ws_n[s0:s0 + ns], ts_n[s0:s0 + ns], de_n[s0:s0 + ns]
        W, WT = np.cumsum(w), np.cumsum(w * t)
        dist_ref[r] = np.sum(2 * w * (t * W - WT) + w * w * de / 3.0)
        depth_ref[r] = np.sum(w * (t - td_n[r]) ** 2)
    np.testing.assert_allclose(np.asarray(d['distortion']), 0.001 * dist_ref,
                               rtol=2e-2, atol=1e-7)
    np.testing.assert_allclose(np.asarray(d['depth']), 0.01 * depth_ref,
                               rtol=1e-4, atol=1e-7)
    np.testing.assert_allclose(
        np.asarray(d['rgb']),
        (np.asarray(rgb_pred)[:b] - np.asarray(target_rgb)) ** 2,
        rtol=1e-5, atol=1e-6)
    o_ref = np.asarray(opacity)[:b] + 1e-10
    np.testing.assert_allclose(np.asarray(d['opacity']),
                               0.001 * (-o_ref * np.log(o_ref)),
                               rtol=1e-5, atol=1e-7)
    np.testing.assert_allclose(
        np.asarray(d['depth_regularization']),
        0.01 * ws_n ** 2 * (np.asarray(mask) > 0),
        rtol=1e-5, atol=1e-8)

    print("KERNEL_OK")
</pallas_src>

<mosaic_0001>
module attributes {stable_mosaic.version = 11 : i64} {
  func.func @_elementwise_kernel(%arg0: memref<3x4xf32, #tpu.memory_space<vmem>>, %arg1: memref<3x4xf32, #tpu.memory_space<vmem>>, %arg2: memref<1x4xf32, #tpu.memory_space<vmem>>, %arg3: memref<8x128xf32, #tpu.memory_space<vmem>>, %arg4: memref<8x128xi32, #tpu.memory_space<vmem>>, %arg5: memref<3x4xf32, #tpu.memory_space<vmem>>, %arg6: memref<1x4xf32, #tpu.memory_space<vmem>>, %arg7: memref<8x128xf32, #tpu.memory_space<vmem>>) attributes {dimension_semantics = [], scalar_prefetch = 0 : i64, scratch_operands = 0 : i64, tpu.core_type = #tpu.core_type<tc>} {
    %c0 = arith.constant 0 : index
    %c0_0 = arith.constant 0 : index
    %0 = vector.load %arg0[%c0, %c0_0] : memref<3x4xf32, #tpu.memory_space<vmem>>, vector<3x4xf32>
    %c0_1 = arith.constant 0 : index
    %c0_2 = arith.constant 0 : index
    %1 = vector.load %arg1[%c0_1, %c0_2] : memref<3x4xf32, #tpu.memory_space<vmem>>, vector<3x4xf32>
    %2 = arith.subf %0, %1 : vector<3x4xf32>
    %3 = arith.mulf %2, %2 : vector<3x4xf32>
    %c0_3 = arith.constant 0 : index
    %c0_4 = arith.constant 0 : index
    %4 = vector.load %arg5[%c0_3, %c0_4] : memref<3x4xf32, #tpu.memory_space<vmem>>, vector<3x4xf32>
    tpu.vector_store %arg5[%c0_3, %c0_4], %3 {strides = array<i32>} : memref<3x4xf32, #tpu.memory_space<vmem>>, vector<3x4xf32>,
    %c0_5 = arith.constant 0 : index
    %c0_6 = arith.constant 0 : index
    %5 = vector.load %arg2[%c0_5, %c0_6] : memref<1x4xf32, #tpu.memory_space<vmem>>, vector<1x4xf32>
    %cst = arith.constant 1.000000e-10 : f32
    %6 = vector.broadcast %cst : f32 to vector<1x4xf32>
    %7 = arith.addf %5, %6 : vector<1x4xf32>
    %cst_7 = arith.constant 0.000000e+00 : f32
    %8 = vector.broadcast %cst_7 : f32 to vector<1x4xf32>
    %9 = arith.subf %8, %7 : vector<1x4xf32>
    %10 = math.log %7 : vector<1x4xf32>
    %11 = arith.mulf %9, %10 : vector<1x4xf32>
    %c0_8 = arith.constant 0 : index
    %c0_9 = arith.constant 0 : index
    %12 = vector.load %arg6[%c0_8, %c0_9] : memref<1x4xf32, #tpu.memory_space<vmem>>, vector<1x4xf32>
    tpu.vector_store %arg6[%c0_8, %c0_9], %11 {strides = array<i32>} : memref<1x4xf32, #tpu.memory_space<vmem>>, vector<1x4xf32>,
    %c0_10 = arith.constant 0 : index
    %c0_11 = arith.constant 0 : index
    %13 = vector.load %arg3[%c0_10, %c0_11] : memref<8x128xf32, #tpu.memory_space<vmem>>, vector<8x128xf32>
    %c0_12 = arith.constant 0 : index
    %c0_13 = arith.constant 0 : index
    %14 = vector.load %arg4[%c0_12, %c0_13] : memref<8x128xi32, #tpu.memory_space<vmem>>, vector<8x128xi32>
    %c0_i32 = arith.constant 0 : i32
    %15 = vector.broadcast %c0_i32 : i32 to vector<8x128xi32>
    %16 = arith.cmpi sgt, %14, %15 : vector<8x128xi32>
    %17 = arith.mulf %13, %13 : vector<8x128xf32>
    %cst_14 = arith.constant 0.000000e+00 : f32
    %18 = vector.broadcast %cst_14 : f32 to vector<8x128xf32>
    %19 = arith.select %16, %17, %18 : vector<8x128xi1>, vector<8x128xf32>
    %c0_15 = arith.constant 0 : index
    %c0_16 = arith.constant 0 : index
    %20 = vector.load %arg7[%c0_15, %c0_16] : memref<8x128xf32, #tpu.memory_space<vmem>>, vector<8x128xf32>
    tpu.vector_store %arg7[%c0_15, %c0_16], %19 {strides = array<i32>} : memref<8x128xf32, #tpu.memory_space<vmem>>, vector<8x128xf32>,
    return
  }
}

</mosaic_0001>

<bundles_post_ra>
// kernel: tpu_custom_call.1
= control target key start
LH: loop header
LB: loop body
LE: loop exit
PB: predicated region body
PF: predicated region fallthrough
CT: control target
= control target key end

     0   :  { %13 = vsyncpa [#allocation3], 0  ;;  %s408_s0 = inlined_call_operand.hbm [shape: f32[3,4], index: 0, kind: input, shape index: {}]   ;;  %s409_s1 = inlined_call_operand.hbm [shape: f32[3,4], index: 1, kind: input, shape index: {}]   ;;  %s410_s2 = inlined_call_operand.vmem [shape: f32[1,4], index: 2, kind: input, shape index: {}]   ;;  %s411_s3 = inlined_call_operand.hbm [shape: f32[8,128], index: 3, kind: input, shape index: {}]   ;;  %s412_s4 = inlined_call_operand.hbm [shape: s32[8,128], index: 4, kind: input, shape index: {}]   ;;  %s413_s5 = inlined_call_operand.hbm [shape: f32[3,4], index: 5, kind: output, shape index: {0}]   ;;  %s414_s6 = inlined_call_operand.hbm [shape: f32[1,4], index: 6, kind: output, shape index: {1}]   ;;  %s415_s7 = inlined_call_operand.hbm [shape: f32[8,128], index: 7, kind: output, shape index: {2}]  }
   0x1   :  { %14 = vsyncpa [#allocation6], 0 }
   0x2   :  { %15 = vsyncpa [#allocation9], 0 }
   0x3   :  { %16 = vsyncpa [#allocation4], 0  ;;  %s34_s26 = sshll.u32 %s409_s1, 4  ;;  %s35_s26 = int_to_ptr.hbm [resolvable:$true] %s34_s26 }
   0x4   :  { %17 = vsyncpa [#allocation12], 0  ;;  %s337_s27 = smov [#allocation5]   ;;  %s23_s8 = sshll.u32 %s408_s0, 4  ;;  %s24_s8 = int_to_ptr.hbm [resolvable:$true] %s23_s8 }
   0x5   :  { %s36_s28 = sshll.u32 %s337_s27, 4  ;;  %s338_s9 = smov [#allocation2]   ;;  %s37_s28 = int_to_ptr.vmem [resolvable:$true] %s36_s28 }
   0x6   :  { %39 = dma.hbm_to_vmem [thread:$0]  %s35_s26, 64, %s37_s28, [#allocation6]  }
   0x7   :  { %s25_s10 = sshll.u32 %s338_s9, 4  ;;  %s47_s13 = sshll.u32 %s411_s3, 4  ;;  %s26_s10 = int_to_ptr.vmem [resolvable:$true] %s25_s10  ;;  %s48_s13 = int_to_ptr.hbm [resolvable:$true] %s47_s13 }
   0x8   :  { %28 = dma.hbm_to_vmem [thread:$0]  %s24_s8, 64, %s26_s10, [#allocation3]  }
   0x9   :  { %s58_s15 = sshll.u32 %s412_s4, 4  ;;  %s339_s16 = smov [#allocation7]   ;;  %s59_s15 = int_to_ptr.hbm [resolvable:$true] %s58_s15 }
   0xa   :  { %s49_s17 = sshll.u32 %s339_s16, 4  ;;  %s340_s0 = smov [#allocation8]   ;;  %s50_s17 = int_to_ptr.vmem [resolvable:$true] %s49_s17 }
   0xb   :  { %52 = dma.hbm_to_vmem [thread:$0]  %s48_s13, 128, %s50_s17, [#allocation6]  }
   0xc   :  { %s60_s18 = sshll.u32 %s340_s0, 4  ;;  %s61_s18 = int_to_ptr.vmem [resolvable:$true] %s60_s18 }
   0xd   :  { %63 = dma.hbm_to_vmem [thread:$0]  %s59_s15, 128, %s61_s18, [#allocation9]  }
   0xe   :  { %327 = dma.done.wait [#allocation3], 64  }
   0xf   :  { %328 = vsyncadd [#allocation3], 4294967232 }
  0x10   :  { %329 = dma.done.wait [#allocation6], 192  }
  0x11   :  { %330 = vsyncadd [#allocation6], 4294967104 }
  0x12   :  { %331 = dma.done.wait [#allocation9], 128  }
  0x13   :  { %332 = vsyncadd [#allocation9], 4294967168  ;;  %s341_s3 = smov [#allocation10]   ;;  %s107_s4 = sshll.u32 %s413_s5, 4  ;;  %v86_v0 = vld [vmem:[%s410_s2] sm:$0x1]  ;;  %s108_s4 = int_to_ptr.hbm [resolvable:$true] %s107_s4 }
  0x14   :  { %s105_s19 = sshll.u32 %s341_s3, 4  ;;  %v80_v1 = vld [vmem:[#allocation2] sm:$0x7]  ;;  %v81_v2 = vld [vmem:[#allocation5] sm:$0x7]  ;;  %v94_v5 = vld [vmem:[#allocation7] sm:$0xff]  ;;  %s106_s19 = int_to_ptr.vmem [resolvable:$true] %s105_s19 }
  0x15   :  { %v87_v3 = vadd.f32 1e-10, %v86_v0  ;;  %v82_v4 = vsub.f32 %v80_v1, %v81_v2  ;;  %v95_v6 = vld [vmem:[#allocation8] sm:$0xff]  ;;  %vm84_vm0 = vcmask 26624   ;;  %v97_v7 = vmul.f32 %v94_v5, %v94_v5  ;;  %s342_s2 = smov [#allocation11]   ;;  %s118_s26 = sshll.u32 %s414_s6, 4  ;;  %s119_s26 = int_to_ptr.hbm [resolvable:$true] %s118_s26 }
  0x16   :  { %vm96_vm1 = vcmp.gt.s32.totalorder %v95_v6, 0  ;;  %s116_s5 = sshll.u32 %s342_s2, 4  ;;  %s343_s27 = smov [#allocation13]   ;;  %vm92_vm2 = vcmask 24576   ;;  %s117_s5 = int_to_ptr.vmem [resolvable:$true] %s116_s5 }
  0x17   :  { %157 = vlog2.f32 %v87_v3  ;;  %v83_v8 = vmul.f32 %v82_v4, %v82_v4  ;;  %v98_v9 = vsel %vm96_vm1, %v97_v7, 0.0  ;;  %v88_v10 = vsub.f32 0.0, %v87_v3  ;;  %s127_s28 = sshll.u32 %s343_s27, 4  ;;  %s129_s8 = sshll.u32 %s415_s7, 4  ;;  %s128_s28 = int_to_ptr.vmem [resolvable:$true] %s127_s28  ;;  %s130_s8 = int_to_ptr.hbm [resolvable:$true] %s129_s8 }
  0x18   :  { %99 = vst [vmem:[#allocation13] sm:$0xff] %v98_v9 }
  0x19   :  { %85 = vst.msk [vmem:[#allocation10] sm:$0x7] %vm84_vm0, %v83_v8 }
  0x1a   :  { %110 = dma.vmem_to_hbm [thread:$0]  %s106_s19, 64, %s108_s4, [#allocation4]  }
  0x1d   :  { %v158_v11 = vpop.eup %157 }
  0x1e   :  { %v90_v12 = vmul.f32 0.6931472, %v158_v11 }
  0x20   :  { %v91_v13 = vmul.f32 %v90_v12, %v88_v10 }
  0x22   :  { %93 = vst.msk [vmem:[#allocation11] sm:$0x1] %vm92_vm2, %v91_v13 }
  0x23   :  { %121 = dma.vmem_to_hbm [thread:$0]  %s117_s5, 16, %s119_s26, [#allocation12]  }
  0x24   :  { %132 = dma.vmem_to_hbm [thread:$0]  %s128_s28, 128, %s130_s8, [#allocation12]  }
  0x25   :  { %333 = dma.done.wait [#allocation4], 64  }
  0x26   :  { %334 = vsyncadd [#allocation4], 4294967232 }
  0x27   :  { %335 = dma.done.wait [#allocation12], 144  }
  0x28   :  { %336 = vsyncadd [#allocation12], 4294967152 }
  0x29   :  { %145 = vsyncpa [#allocation3], 1 }
  0x2a   :  { %146 = vsyncpa [#allocation6], 1 }
  0x2b   :  { %147 = vsyncpa [#allocation9], 1 }
  0x2c   :  { %148 = vsyncpa [#allocation4], 1 }
  0x2d   :  { %149 = vsyncpa [#allocation12], 1 }

</bundles_post_ra>
